<compile_context>
chip_gen: v6e
topology: v6e:2x2x1
jax: 0.10.0
libtpu: 0.0.40
codegen_flags: <defaults>
</compile_context>

<pallas_src>
import functools

import jax
import jax.numpy as jnp
from jax.experimental import pallas as pl
from jax.experimental.pallas import tpu as pltpu


def _round_up(x, m):
    return (x + m - 1) // m * m


# ---------------------------------------------------------------------------
# Pallas kernel: one (batch, L-tile) grid point.
#   conv1(k=3,stride,pad=1) -> BN1 -> ReLU -> conv2(k=3,1,pad=1) -> BN2
#   + shortcut(1x1 conv,stride + BN | identity) -> ReLU
# ---------------------------------------------------------------------------
def _basic_block_kernel(*refs, tl, l_out, has_downsample):
    if has_downsample:
        (x1_ref, xsc_ref, w1_ref, w2_ref, wsc_ref,
         s1_ref, b1_ref, s2_ref, b2_ref, ssc_ref, bsc_ref, out_ref) = refs
    else:
        (x1_ref, xsc_ref, w1_ref, w2_ref,
         s1_ref, b1_ref, s2_ref, b2_ref, out_ref) = refs

    t = pl.program_id(1)

    # conv1: all 3 taps fused via wrapper-side im2col -> single MXU matmul.
    # x1_ref is (TL+2, 3*Cin_p): output positions [t*TL - 1, t*TL + TL] (halo of 1
    # on each side, needed by conv2).
    h = jnp.dot(x1_ref[...], w1_ref[...], preferred_element_type=jnp.float32)
    h = jnp.maximum(h * s1_ref[...] + b1_ref[...], 0.0)            # BN1 + ReLU, f32

    # Rows whose global position is -1 or >= l_out are conv2's zero padding
    # (and length-padding overrun); zero them with a cheap VPU select.
    pos = t * tl + jax.lax.broadcasted_iota(jnp.int32, (tl + 2, 1), 0) - 1
    h = jnp.where((pos >= 0) & (pos < l_out), h, 0.0)
    h = h.astype(w2_ref.dtype)                                     # bf16 for the MXU

    # conv2 (k=3, stride 1): three taps read from the halo'd h, f32 accumulate.
    acc = jnp.dot(h[0:tl], w2_ref[0], preferred_element_type=jnp.float32)
    acc = acc + jnp.dot(h[1:tl + 1], w2_ref[1], preferred_element_type=jnp.float32)
    acc = acc + jnp.dot(h[2:tl + 2], w2_ref[2], preferred_element_type=jnp.float32)
    acc = acc * s2_ref[...] + b2_ref[...]                          # BN2

    # Shortcut: 1x1 strided conv + BN, or plain identity add (no eye-matmul).
    if has_downsample:
        sc = jnp.dot(xsc_ref[...], wsc_ref[...], preferred_element_type=jnp.float32)
        sc = sc * ssc_ref[...] + bsc_ref[...]
    else:
        sc = xsc_ref[...].astype(jnp.float32)

    out_ref[...] = jnp.maximum(acc + sc, 0.0).astype(out_ref.dtype)


# ---------------------------------------------------------------------------
# Wrapper: layout, channel padding, im2col, BN folding, pallas_call.
# ---------------------------------------------------------------------------
def _fold_bn(gamma, beta, mean, var, c_out_p, eps=1e-5):
    scale = gamma / jnp.sqrt(var + eps)
    bias = beta - mean * scale
    scale = jnp.pad(scale, (0, c_out_p - scale.shape[0])).reshape(1, c_out_p)
    bias = jnp.pad(bias, (0, c_out_p - bias.shape[0])).reshape(1, c_out_p)
    return scale.astype(jnp.float32), bias.astype(jnp.float32)


def basic_block_1d(x_ncl, params, stride, *, compute_dtype=jnp.bfloat16, tile_l=256):
    n, c_in, l_in = x_ncl.shape
    c_out = params["conv1_w"].shape[0]
    l_out = (l_in - 1) // stride + 1                 # (L + 2*1 - 3)//stride + 1

    # Lane-dense channel padding and L-tiling (tile sized well under the 32 MiB
    # scoped-VMEM default so double-buffered tiles fit on v5e/v6e/v7x).
    c_in_p = _round_up(c_in, 128)
    c_out_p = _round_up(c_out, 128)
    tl = min(tile_l, _round_up(l_out, 8))
    l_out_p = _round_up(l_out, tl)
    n_tiles = l_out_p // tl

    f32 = jnp.float32
    x_nlc = jnp.transpose(x_ncl, (0, 2, 1)).astype(f32)            # NCL -> NLC
    x_cp = jnp.pad(x_nlc, ((0, 0), (0, 0), (0, c_in_p - c_in)))    # channel pad
    x_lp = jnp.pad(x_cp, ((0, 0), (1, 1), (0, 0)))                 # conv1 length pad

    # conv1 im2col: stride + the 3 taps resolved once, in HBM, by XLA.
    taps = [x_lp[:, k:k + stride * (l_out - 1) + 1:stride, :] for k in range(3)]
    x1 = jnp.concatenate(taps, axis=-1)                            # (N, Lout, 3*Cin_p)
    # Add a 1-row halo on each side (conv2's zero padding) + Lout padding, then
    # materialize per-tile overlapping windows so BlockSpec indexing stays blocked.
    x1 = jnp.pad(x1, ((0, 0), (1, l_out_p - l_out + 1), (0, 0)))
    x1 = jnp.stack([x1[:, t * tl:t * tl + tl + 2, :] for t in range(n_tiles)], axis=1)
    # x1: (N, n_tiles, TL+2, 3*Cin_p)

    # Shortcut input: original x at strided positions (1x1 conv, no padding).
    xsc = x_cp[:, ::stride, :]                                     # (N, Lout, Cin_p)
    xsc = jnp.pad(xsc, ((0, 0), (0, l_out_p - l_out), (0, 0)))
    xsc = xsc.reshape(n, n_tiles, tl, c_in_p)

    # Weights: (Cout, Cin, K) -> per-tap (K, Cin_p, Cout_p); conv1 fused to (3*Cin_p, Cout_p).
    w1 = jnp.transpose(params["conv1_w"], (2, 1, 0)).astype(f32)
    w1 = jnp.pad(w1, ((0, 0), (0, c_in_p - c_in), (0, c_out_p - c_out)))
    w1 = w1.reshape(3 * c_in_p, c_out_p)
    w2 = jnp.transpose(params["conv2_w"], (2, 1, 0)).astype(f32)
    w2 = jnp.pad(w2, ((0, 0), (0, c_out_p - c_out), (0, c_out_p - c_out)))

    s1, b1 = _fold_bn(params["bn1_g"], params["bn1_b"], params["bn1_m"], params["bn1_v"], c_out_p)
    s2, b2 = _fold_bn(params["bn2_g"], params["bn2_b"], params["bn2_m"], params["bn2_v"], c_out_p)

    has_downsample = (stride != 1) or (c_in != c_out)

    cdt = compute_dtype
    args = [x1.astype(cdt), xsc.astype(cdt), w1.astype(cdt), w2.astype(cdt)]
    in_specs = [
        pl.BlockSpec((None, None, tl + 2, 3 * c_in_p), lambda nn, tt: (nn, tt, 0, 0)),
        pl.BlockSpec((None, None, tl, c_in_p), lambda nn, tt: (nn, tt, 0, 0)),
        pl.BlockSpec((3 * c_in_p, c_out_p), lambda nn, tt: (0, 0)),
        pl.BlockSpec((3, c_out_p, c_out_p), lambda nn, tt: (0, 0, 0)),
    ]
    if has_downsample:
        wsc = jnp.transpose(params["sc_w"][:, :, 0], (1, 0)).astype(f32)
        wsc = jnp.pad(wsc, ((0, c_in_p - c_in), (0, c_out_p - c_out)))
        ssc, bsc = _fold_bn(params["sc_g"], params["sc_b"], params["sc_m"], params["sc_v"], c_out_p)
        args.append(wsc.astype(cdt))
        in_specs.append(pl.BlockSpec((c_in_p, c_out_p), lambda nn, tt: (0, 0)))
        bn_args = [s1, b1, s2, b2, ssc, bsc]
    else:
        bn_args = [s1, b1, s2, b2]
    args += bn_args
    in_specs += [pl.BlockSpec((1, c_out_p), lambda nn, tt: (0, 0)) for _ in bn_args]

    kernel = functools.partial(_basic_block_kernel, tl=tl, l_out=l_out,
                               has_downsample=has_downsample)

    out = pl.pallas_call(
        kernel,
        grid=(n, n_tiles),
        out_shape=jax.ShapeDtypeStruct((n, n_tiles, tl, c_out_p), jnp.float32),
        in_specs=in_specs,
        out_specs=pl.BlockSpec((None, None, tl, c_out_p), lambda nn, tt: (nn, tt, 0, 0)),
        compiler_params=pltpu.CompilerParams(
            dimension_semantics=("parallel", "parallel"),
            vmem_limit_bytes=32 * 1024 * 1024),
    )(*args)

    out = out.reshape(n, l_out_p, c_out_p)[:, :l_out, :c_out]
    return jnp.transpose(out, (0, 2, 1))                            # NLC -> NCL


# ---------------------------------------------------------------------------
# Pure-JAX reference (mirrors the PyTorch forward in eval mode, f32).
# ---------------------------------------------------------------------------
def _ref_forward(x, params, stride, eps=1e-5):
    def conv1d(x, w, s, p):
        return jax.lax.conv_general_dilated(
            x, w, (s,), [(p, p)], dimension_numbers=("NCH", "OIH", "NCH"))

    def bn(x, g, b, m, v):
        return ((x - m[None, :, None]) / jnp.sqrt(v[None, :, None] + eps)
                * g[None, :, None] + b[None, :, None])

    out = jax.nn.relu(bn(conv1d(x, params["conv1_w"], stride, 1),
                         params["bn1_g"], params["bn1_b"], params["bn1_m"], params["bn1_v"]))
    out = bn(conv1d(out, params["conv2_w"], 1, 1),
             params["bn2_g"], params["bn2_b"], params["bn2_m"], params["bn2_v"])
    c_in, c_out = x.shape[1], params["conv1_w"].shape[0]
    if stride != 1 or c_in != c_out:
        sc = bn(conv1d(x, params["sc_w"], stride, 0),
                params["sc_g"], params["sc_b"], params["sc_m"], params["sc_v"])
    else:
        sc = x
    return jax.nn.relu(out + sc)


# ---------------------------------------------------------------------------
def _make_params(key, c_in, c_out, downsample):
    ks = jax.random.split(key, 16)
    p = {
        "conv1_w": 0.1 * jax.random.normal(ks[0], (c_out, c_in, 3), jnp.float32),
        "bn1_g": 0.5 + jax.random.uniform(ks[1], (c_out,), jnp.float32),
        "bn1_b": 0.1 * jax.random.normal(ks[2], (c_out,), jnp.float32),
        "bn1_m": 0.1 * jax.random.normal(ks[3], (c_out,), jnp.float32),
        "bn1_v": 0.5 + jax.random.uniform(ks[4], (c_out,), jnp.float32),
        "conv2_w": 0.1 * jax.random.normal(ks[5], (c_out, c_out, 3), jnp.float32),
        "bn2_g": 0.5 + jax.random.uniform(ks[6], (c_out,), jnp.float32),
        "bn2_b": 0.1 * jax.random.normal(ks[7], (c_out,), jnp.float32),
        "bn2_m": 0.1 * jax.random.normal(ks[8], (c_out,), jnp.float32),
        "bn2_v": 0.5 + jax.random.uniform(ks[9], (c_out,), jnp.float32),
    }
    if downsample:
        p.update({
            "sc_w": 0.1 * jax.random.normal(ks[10], (c_out, c_in, 1), jnp.float32),
            "sc_g": 0.5 + jax.random.uniform(ks[11], (c_out,), jnp.float32),
            "sc_b": 0.1 * jax.random.normal(ks[12], (c_out,), jnp.float32),
            "sc_m": 0.1 * jax.random.normal(ks[13], (c_out,), jnp.float32),
            "sc_v": 0.5 + jax.random.uniform(ks[14], (c_out,), jnp.float32),
        })
    return p


def _check(x, params, stride, compute_dtype, atol, rtol):
    out = jax.block_until_ready(basic_block_1d(x, params, stride, compute_dtype=compute_dtype))
    ref = jax.block_until_ready(_ref_forward(x, params, stride))
    n, c_in, l = x.shape
    c_out = params["conv1_w"].shape[0]
    l_out = (l - 1) // stride + 1
    assert out.shape == ref.shape == (n, c_out, l_out), (out.shape, ref.shape)
    err = float(jnp.max(jnp.abs(out - ref)))
    assert jnp.allclose(out, ref, atol=atol, rtol=rtol), err


if __name__ == "__main__":
    key = jax.random.PRNGKey(0)
    kp1, kp2, kx1, kx2 = jax.random.split(key, 4)

    # Case 1: downsample block (stride 2, 4 -> 8 channels).
    params_ds = _make_params(kp1, 4, 8, downsample=True)
    x_ds = jax.random.normal(kx1, (2, 4, 16), jnp.float32)          # PyTorch NCL
    # strict check in f32 compute (bit-for-bit same math path as reference)
    _check(x_ds, params_ds, 2, jnp.float32, atol=1e-4, rtol=1e-4)
    # default bf16 MXU inputs / f32 accumulate (looser tolerance due to bf16 rounding)
    _check(x_ds, params_ds, 2, jnp.bfloat16, atol=5e-2, rtol=5e-2)

    # Case 2: identity-shortcut block (stride 1, 8 -> 8 channels).
    params_id = _make_params(kp2, 8, 8, downsample=False)
    x_id = jax.random.normal(kx2, (2, 8, 16), jnp.float32)
    _check(x_id, params_id, 1, jnp.bfloat16, atol=5e-2, rtol=5e-2)

    print("KERNEL_OK")
</pallas_src>

<mosaic_0001>
module attributes {stable_mosaic.version = 11 : i64} {
  func.func @_basic_block_kernel(%arg0: i32, %arg1: i32, %arg2: memref<1x1x10x384xf32, #tpu.memory_space<vmem>>, %arg3: memref<1x1x8x128xf32, #tpu.memory_space<vmem>>, %arg4: memref<384x128xf32, #tpu.memory_space<vmem>>, %arg5: memref<3x128x128xf32, #tpu.memory_space<vmem>>, %arg6: memref<128x128xf32, #tpu.memory_space<vmem>>, %arg7: memref<1x128xf32, #tpu.memory_space<vmem>>, %arg8: memref<1x128xf32, #tpu.memory_space<vmem>>, %arg9: memref<1x128xf32, #tpu.memory_space<vmem>>, %arg10: memref<1x128xf32, #tpu.memory_space<vmem>>, %arg11: memref<1x128xf32, #tpu.memory_space<vmem>>, %arg12: memref<1x128xf32, #tpu.memory_space<vmem>>, %arg13: memref<1x1x8x128xf32, #tpu.memory_space<vmem>>) attributes {dimension_semantics = [#tpu.dimension_semantics<parallel>, #tpu.dimension_semantics<parallel>], iteration_bounds = array<i64: 2, 1>, scalar_prefetch = 0 : i64, scratch_operands = 0 : i64, tpu.core_type = #tpu.core_type<tc>, window_params = [{transform_indices = @transform_0, window_bounds = array<i64: 1, 1, 10, 384>}, {transform_indices = @transform_1, window_bounds = array<i64: 1, 1, 8, 128>}, {pipeline_mode = #tpu.pipeline_mode<synchronous>, transform_indices = @transform_2, window_bounds = array<i64: 384, 128>}, {pipeline_mode = #tpu.pipeline_mode<synchronous>, transform_indices = @transform_3, window_bounds = array<i64: 3, 128, 128>}, {pipeline_mode = #tpu.pipeline_mode<synchronous>, transform_indices = @transform_4, window_bounds = array<i64: 128, 128>}, {pipeline_mode = #tpu.pipeline_mode<synchronous>, transform_indices = @transform_5, window_bounds = array<i64: 1, 128>}, {pipeline_mode = #tpu.pipeline_mode<synchronous>, transform_indices = @transform_6, window_bounds = array<i64: 1, 128>}, {pipeline_mode = #tpu.pipeline_mode<synchronous>, transform_indices = @transform_7, window_bounds = array<i64: 1, 128>}, {pipeline_mode = #tpu.pipeline_mode<synchronous>, transform_indices = @transform_8, window_bounds = array<i64: 1, 128>}, {pipeline_mode = #tpu.pipeline_mode<synchronous>, transform_indices = @transform_9, window_bounds = array<i64: 1, 128>}, {pipeline_mode = #tpu.pipeline_mode<synchronous>, transform_indices = @transform_10, window_bounds = array<i64: 1, 128>}, {transform_indices = @transform_11, window_bounds = array<i64: 1, 1, 8, 128>}]} {
    %c0 = arith.constant 0 : index
    %c0_0 = arith.constant 0 : index
    %c0_1 = arith.constant 0 : index
    %c0_2 = arith.constant 0 : index
    %0 = vector.load %arg2[%c0, %c0_0, %c0_1, %c0_2] : memref<1x1x10x384xf32, #tpu.memory_space<vmem>>, vector<1x1x10x384xf32>
    %1 = vector.shape_cast %0 : vector<1x1x10x384xf32> to vector<10x384xf32>
    %c0_3 = arith.constant 0 : index
    %c0_4 = arith.constant 0 : index
    %2 = vector.load %arg4[%c0_3, %c0_4] : memref<384x128xf32, #tpu.memory_space<vmem>>, vector<384x128xf32>
    %cst = arith.constant dense<0.000000e+00> : vector<10x128xf32>
    %3 = tpu.matmul %1, %2, %cst {dimension_numbers = #tpu.dot_dimension_numbers<[1], [0], [0], [1], [0, 0, 1, 1], [], []>} : vector<10x384xf32>, vector<384x128xf32>, vector<10x128xf32> -> vector<10x128xf32>
    %c0_5 = arith.constant 0 : index
    %c0_6 = arith.constant 0 : index
    %4 = vector.load %arg7[%c0_5, %c0_6] : memref<1x128xf32, #tpu.memory_space<vmem>>, vector<1x128xf32>
    %5 = vector.broadcast %4 : vector<1x128xf32> to vector<10x128xf32>
    %6 = arith.mulf %3, %5 : vector<10x128xf32>
    %c0_7 = arith.constant 0 : index
    %c0_8 = arith.constant 0 : index
    %7 = vector.load %arg8[%c0_7, %c0_8] : memref<1x128xf32, #tpu.memory_space<vmem>>, vector<1x128xf32>
    %8 = vector.broadcast %7 : vector<1x128xf32> to vector<10x128xf32>
    %9 = arith.addf %6, %8 : vector<10x128xf32>
    %cst_9 = arith.constant 0.000000e+00 : f32
    %10 = vector.broadcast %cst_9 : f32 to vector<10x128xf32>
    %11 = arith.maximumf %9, %10 : vector<10x128xf32>
    %c8_i32 = arith.constant 8 : i32
    %12 = arith.muli %arg1, %c8_i32 : i32
    %13 = tpu.iota {dimensions = array<i32: 0>} : vector<10x1xi32>
    %14 = vector.broadcast %12 : i32 to vector<10x1xi32>
    %15 = arith.addi %14, %13 : vector<10x1xi32>
    %c1_i32 = arith.constant 1 : i32
    %16 = vector.broadcast %c1_i32 : i32 to vector<10x1xi32>
    %17 = arith.subi %15, %16 : vector<10x1xi32>
    %c0_i32 = arith.constant 0 : i32
    %18 = vector.broadcast %c0_i32 : i32 to vector<10x1xi32>
    %19 = arith.cmpi sge, %17, %18 : vector<10x1xi32>
    %c8_i32_10 = arith.constant 8 : i32
    %20 = vector.broadcast %c8_i32_10 : i32 to vector<10x1xi32>
    %21 = arith.cmpi slt, %17, %20 : vector<10x1xi32>
    %22 = arith.andi %19, %21 : vector<10x1xi1>
    %cst_11 = arith.constant 0.000000e+00 : f32
    %23 = vector.shape_cast %22 : vector<10x1xi1> to vector<10x1xi1>
    %24 = vector.broadcast %23 : vector<10x1xi1> to vector<10x128xi1>
    %25 = vector.broadcast %cst_11 : f32 to vector<10x128xf32>
    %26 = arith.select %24, %11, %25 : vector<10x128xi1>, vector<10x128xf32>
    %27 = vector.extract_strided_slice %26 {offsets = [0, 0], sizes = [8, 128], strides = [1, 1]} : vector<10x128xf32> to vector<8x128xf32>
    %c0_12 = arith.constant 0 : index
    %c0_13 = arith.constant 0 : index
    %c0_14 = arith.constant 0 : index
    %28 = vector.load %arg5[%c0_12, %c0_13, %c0_14] : memref<3x128x128xf32, #tpu.memory_space<vmem>>, vector<1x128x128xf32>
    %29 = vector.shape_cast %28 : vector<1x128x128xf32> to vector<128x128xf32>
    %cst_15 = arith.constant dense<0.000000e+00> : vector<8x128xf32>
    %30 = tpu.matmul %27, %29, %cst_15 {dimension_numbers = #tpu.dot_dimension_numbers<[1], [0], [0], [1], [0, 0, 1, 1], [], []>} : vector<8x128xf32>, vector<128x128xf32>, vector<8x128xf32> -> vector<8x128xf32>
    %31 = vector.extract_strided_slice %26 {offsets = [1, 0], sizes = [8, 128], strides = [1, 1]} : vector<10x128xf32> to vector<8x128xf32>
    %c1 = arith.constant 1 : index
    %c0_16 = arith.constant 0 : index
    %c0_17 = arith.constant 0 : index
    %32 = vector.load %arg5[%c1, %c0_16, %c0_17] : memref<3x128x128xf32, #tpu.memory_space<vmem>>, vector<1x128x128xf32>
    %33 = vector.shape_cast %32 : vector<1x128x128xf32> to vector<128x128xf32>
    %cst_18 = arith.constant dense<0.000000e+00> : vector<8x128xf32>
    %34 = tpu.matmul %31, %33, %cst_18 {dimension_numbers = #tpu.dot_dimension_numbers<[1], [0], [0], [1], [0, 0, 1, 1], [], []>} : vector<8x128xf32>, vector<128x128xf32>, vector<8x128xf32> -> vector<8x128xf32>
    %35 = arith.addf %30, %34 : vector<8x128xf32>
    %36 = vector.extract_strided_slice %26 {offsets = [2, 0], sizes = [8, 128], strides = [1, 1]} : vector<10x128xf32> to vector<8x128xf32>
    %c2 = arith.constant 2 : index
    %c0_19 = arith.constant 0 : index
    %c0_20 = arith.constant 0 : index
    %37 = vector.load %arg5[%c2, %c0_19, %c0_20] : memref<3x128x128xf32, #tpu.memory_space<vmem>>, vector<1x128x128xf32>
    %38 = vector.shape_cast %37 : vector<1x128x128xf32> to vector<128x128xf32>
    %cst_21 = arith.constant dense<0.000000e+00> : vector<8x128xf32>
    %39 = tpu.matmul %36, %38, %cst_21 {dimension_numbers = #tpu.dot_dimension_numbers<[1], [0], [0], [1], [0, 0, 1, 1], [], []>} : vector<8x128xf32>, vector<128x128xf32>, vector<8x128xf32> -> vector<8x128xf32>
    %40 = arith.addf %35, %39 : vector<8x128xf32>
    %c0_22 = arith.constant 0 : index
    %c0_23 = arith.constant 0 : index
    %41 = vector.load %arg9[%c0_22, %c0_23] : memref<1x128xf32, #tpu.memory_space<vmem>>, vector<1x128xf32>
    %42 = vector.broadcast %41 : vector<1x128xf32> to vector<8x128xf32>
    %43 = arith.mulf %40, %42 : vector<8x128xf32>
    %c0_24 = arith.constant 0 : index
    %c0_25 = arith.constant 0 : index
    %44 = vector.load %arg10[%c0_24, %c0_25] : memref<1x128xf32, #tpu.memory_space<vmem>>, vector<1x128xf32>
    %45 = vector.broadcast %44 : vector<1x128xf32> to vector<8x128xf32>
    %46 = arith.addf %43, %45 : vector<8x128xf32>
    %c0_26 = arith.constant 0 : index
    %c0_27 = arith.constant 0 : index
    %c0_28 = arith.constant 0 : index
    %c0_29 = arith.constant 0 : index
    %47 = vector.load %arg3[%c0_26, %c0_27, %c0_28, %c0_29] : memref<1x1x8x128xf32, #tpu.memory_space<vmem>>, vector<1x1x8x128xf32>
    %48 = vector.shape_cast %47 : vector<1x1x8x128xf32> to vector<8x128xf32>
    %c0_30 = arith.constant 0 : index
    %c0_31 = arith.constant 0 : index
    %49 = vector.load %arg6[%c0_30, %c0_31] : memref<128x128xf32, #tpu.memory_space<vmem>>, vector<128x128xf32>
    %cst_32 = arith.constant dense<0.000000e+00> : vector<8x128xf32>
    %50 = tpu.matmul %48, %49, %cst_32 {dimension_numbers = #tpu.dot_dimension_numbers<[1], [0], [0], [1], [0, 0, 1, 1], [], []>} : vector<8x128xf32>, vector<128x128xf32>, vector<8x128xf32> -> vector<8x128xf32>
    %c0_33 = arith.constant 0 : index
    %c0_34 = arith.constant 0 : index
    %51 = vector.load %arg11[%c0_33, %c0_34] : memref<1x128xf32, #tpu.memory_space<vmem>>, vector<1x128xf32>
    %52 = vector.broadcast %51 : vector<1x128xf32> to vector<8x128xf32>
    %53 = arith.mulf %50, %52 : vector<8x128xf32>
    %c0_35 = arith.constant 0 : index
    %c0_36 = arith.constant 0 : index
    %54 = vector.load %arg12[%c0_35, %c0_36] : memref<1x128xf32, #tpu.memory_space<vmem>>, vector<1x128xf32>
    %55 = vector.broadcast %54 : vector<1x128xf32> to vector<8x128xf32>
    %56 = arith.addf %53, %55 : vector<8x128xf32>
    %57 = arith.addf %46, %56 : vector<8x128xf32>
    %cst_37 = arith.constant 0.000000e+00 : f32
    %58 = vector.broadcast %cst_37 : f32 to vector<8x128xf32>
    %59 = arith.maximumf %57, %58 : vector<8x128xf32>
    %c0_38 = arith.constant 0 : index
    %c0_39 = arith.constant 0 : index
    %c0_40 = arith.constant 0 : index
    %c0_41 = arith.constant 0 : index
    %60 = vector.load %arg13[%c0_38, %c0_39, %c0_40, %c0_41] : memref<1x1x8x128xf32, #tpu.memory_space<vmem>>, vector<1x1x8x128xf32>
    %61 = vector.shape_cast %60 : vector<1x1x8x128xf32> to vector<8x128xf32>
    %62 = vector.shape_cast %59 : vector<8x128xf32> to vector<1x1x8x128xf32>
    tpu.vector_store %arg13[%c0_38, %c0_39, %c0_40, %c0_41], %62 {strides = array<i32>} : memref<1x1x8x128xf32, #tpu.memory_space<vmem>>, vector<1x1x8x128xf32>,
    return
  }
  func.func @transform_0(%arg0: i32, %arg1: i32) -> (i32, i32, i32, i32) {
    %c0_i32 = arith.constant 0 : i32
    %c0_i32_0 = arith.constant 0 : i32
    %c0_i32_1 = arith.constant 0 : i32
    return %arg0, %arg1, %c0_i32, %c0_i32_0 : i32, i32, i32, i32
  }
  func.func @transform_1(%arg0: i32, %arg1: i32) -> (i32, i32, i32, i32) {
    %c0_i32 = arith.constant 0 : i32
    %c0_i32_0 = arith.constant 0 : i32
    %c0_i32_1 = arith.constant 0 : i32
    return %arg0, %arg1, %c0_i32, %c0_i32_0 : i32, i32, i32, i32
  }
  func.func @transform_2(%arg0: i32, %arg1: i32) -> (i32, i32) {
    %c0_i32 = arith.constant 0 : i32
    %c0_i32_0 = arith.constant 0 : i32
    %c0_i32_1 = arith.constant 0 : i32
    return %c0_i32, %c0_i32_0 : i32, i32
  }
  func.func @transform_3(%arg0: i32, %arg1: i32) -> (i32, i32, i32) {
    %c0_i32 = arith.constant 0 : i32
    %c0_i32_0 = arith.constant 0 : i32
    %c0_i32_1 = arith.constant 0 : i32
    %c0_i32_2 = arith.constant 0 : i32
    return %c0_i32, %c0_i32_0, %c0_i32_1 : i32, i32, i32
  }
  func.func @transform_4(%arg0: i32, %arg1: i32) -> (i32, i32) {
    %c0_i32 = arith.constant 0 : i32
    %c0_i32_0 = arith.constant 0 : i32
    %c0_i32_1 = arith.constant 0 : i32
    return %c0_i32, %c0_i32_0 : i32, i32
  }
  func.func @transform_5(%arg0: i32, %arg1: i32) -> (i32, i32) {
    %c0_i32 = arith.constant 0 : i32
    %c0_i32_0 = arith.constant 0 : i32
    %c0_i32_1 = arith.constant 0 : i32
    return %c0_i32, %c0_i32_0 : i32, i32
  }
  func.func @transform_6(%arg0: i32, %arg1: i32) -> (i32, i32) {
    %c0_i32 = arith.constant 0 : i32
    %c0_i32_0 = arith.constant 0 : i32
    %c0_i32_1 = arith.constant 0 : i32
    return %c0_i32, %c0_i32_0 : i32, i32
  }
  func.func @transform_7(%arg0: i32, %arg1: i32) -> (i32, i32) {
    %c0_i32 = arith.constant 0 : i32
    %c0_i32_0 = arith.constant 0 : i32
    %c0_i32_1 = arith.constant 0 : i32
    return %c0_i32, %c0_i32_0 : i32, i32
  }
  func.func @transform_8(%arg0: i32, %arg1: i32) -> (i32, i32) {
    %c0_i32 = arith.constant 0 : i32
    %c0_i32_0 = arith.constant 0 : i32
    %c0_i32_1 = arith.constant 0 : i32
    return %c0_i32, %c0_i32_0 : i32, i32
  }
  func.func @transform_9(%arg0: i32, %arg1: i32) -> (i32, i32) {
    %c0_i32 = arith.constant 0 : i32
    %c0_i32_0 = arith.constant 0 : i32
    %c0_i32_1 = arith.constant 0 : i32
    return %c0_i32, %c0_i32_0 : i32, i32
  }
  func.func @transform_10(%arg0: i32, %arg1: i32) -> (i32, i32) {
    %c0_i32 = arith.constant 0 : i32
    %c0_i32_0 = arith.constant 0 : i32
    %c0_i32_1 = arith.constant 0 : i32
    return %c0_i32, %c0_i32_0 : i32, i32
  }
  func.func @transform_11(%arg0: i32, %arg1: i32) -> (i32, i32, i32, i32) {
    %c0_i32 = arith.constant 0 : i32
    %c0_i32_0 = arith.constant 0 : i32
    %c0_i32_1 = arith.constant 0 : i32
    return %arg0, %arg1, %c0_i32, %c0_i32_0 : i32, i32, i32, i32
  }
}

</mosaic_0001>

<bundles_post_ra>
// kernel: tpu_custom_call.1
= control target key start
LH: loop header
LB: loop body
LE: loop exit
PB: predicated region body
PF: predicated region fallthrough
CT: control target
= control target key end

     0   :  { %16 = vsyncpa [#allocation3], 0  ;;  %s2148_s0 = inlined_call_operand.vmem [shape: f32[2,1,10,384], index: 0, kind: input, shape index: {}]   ;;  %s2149_s1 = inlined_call_operand.vmem [shape: f32[2,1,8,128], index: 1, kind: input, shape index: {}]   ;;  %s2150_s2 = inlined_call_operand.hbm [shape: f32[384,128], index: 2, kind: input, shape index: {}]   ;;  %s2151_s3 = inlined_call_operand.hbm [shape: f32[3,128,128], index: 3, kind: input, shape index: {}]   ;;  %s2152_s4 = inlined_call_operand.vmem [shape: f32[128,128], index: 4, kind: input, shape index: {}]   ;;  %s2153_s5 = inlined_call_operand.vmem [shape: f32[1,128], index: 5, kind: input, shape index: {}]   ;;  %s2154_s6 = inlined_call_operand.vmem [shape: f32[1,128], index: 6, kind: input, shape index: {}]   ;;  %s2155_s7 = inlined_call_operand.vmem [shape: f32[1,128], index: 7, kind: input, shape index: {}]   ;;  %s2156_s8 = inlined_call_operand.vmem [shape: f32[1,128], index: 8, kind: input, shape index: {}]   ;;  %s2157_s9 = inlined_call_operand.vmem [shape: f32[1,128], index: 9, kind: input, shape index: {}]   ;;  %s2158_s10 = inlined_call_operand.vmem [shape: f32[1,128], index: 10, kind: input, shape index: {}]   ;;  %s2159_s11 = inlined_call_operand.hbm [shape: f32[2,1,8,128], index: 11, kind: output, shape index: {}]  }
   0x1   :  { %17 = vsyncpa [#allocation6], 0 }
   0x2   :  { %18 = vsyncpa [#allocation4], 0 }
   0x3   :  { %20 = vsyncpa [#allocation4 + $0x1], 0  ;;  %s1850_s17 = smov 0   ;;  %s1852_s18 = smov 0  }
   0x4   :  { %s1854_s19 = smov 0   ;;  %s1856_s20 = smov 0  }
   0x5   :  { %s1858_s21 = smov 0   ;;  %s1860_s22 = smov 0  }
   0x6 LB: > { %2163 = sst [smem:[#allocation11_spill]] %s1777_s21  ;;  %s1240_s23 = sadd.s32 4294967295, %s1781_s22   ;;  %s1781_s22 = sphi %s1860_s22, %s26_s22   ;;  %s1777_s21 = sphi %s1858_s21, %s2175_s21   ;;  %s1773_s20 = sphi %s1856_s20, %s2174_s20   ;;  %s1769_s19 = sphi %s1854_s19, %s2178_s19   ;;  %s1765_s18 = sphi %s1852_s18, %s2177_s18   ;;  %s1761_s17 = sphi %s1850_s17, %s2176_s17  }
   0x7   : > { %s1241_s24 = sadd.s32 4294967294, %s1781_s22   ;;  %s38_s25 = sadd.s32 1, %s1777_s21 }
   0x8   : > { %s292_s26 = sadd.s32 1, %s1769_s19  ;;  %p40_p0 = scmp.ge.s32.totalorder %s38_s25, 2 }
   0x9   : > { %p302_p1 = scmp.ne.s32.totalorder %s1769_s19, %s1765_s18  ;;  %p303_p2 = scmp.eq.s32.totalorder %s1240_s23, 1 }
   0xa   : > { %p308_p3 = scmp.ne.s32.totalorder %s1765_s18, %s1761_s17  ;;  %s2180_s25 = smov (%p40_p0, %s38_s25), 0 }
   0xb   : > { %2164 = sst [smem:[#allocation12_spill]] %s2180_s25  ;;  %p1890_p4 = por %p303_p2, %p302_p1 }
   0xc   : > { %p309_p5 = scmp.eq.s32.totalorder %s1241_s24, 1  ;;  %s287_s28 = ssub.s32 %s1777_s21, %s2180_s25 }
   0xd   : > { %s2165_s27 = scalar_select %p1890_p4, 1, 0 }
   0xe   : > { %p1242_p6 = scmp.ge.s32.totalorder %s1781_s22, 1  ;;  %p290_p7 = scmp.eq.s32.totalorder %s287_s28, 0 }
   0xf   : > { %p1897_p8 = por %p309_p5, %p308_p3  ;;  %p316_p9 = scmp.lt.s32.totalorder %s1781_s22, 3 }
  0x10   : > { %s1903_s30 = scalar_select %p290_p7, %s1769_s19, %s292_s26  }
  0x11   : > { %s2166_s29 = scalar_select %p1897_p8, 1, 0 }
  0x12   : > { %2167 = sst [smem:[#allocation13_spill]] %s1903_s30  ;;  %p1905_p10 = pnand %p1242_p6, %p316_p9 }
  0x13   : > { %p1909_p11 = scmp.eq.s32.totalorder %s1240_s23, 0  ;;  %s1783_s14 = smov [#allocation2]  }
  0x14   : > { %p1575_p12 = pneg %p1905_p10  ;;  %s328_s15 = sshll.u32 %s1783_s14, 4  ;;  %s329_s15 = int_to_ptr.vmem [resolvable:$true] %s328_s15 }
  0x15   : > { %s1784_s24 = smov [#allocation5]   ;;  %s1656_s23 = scalar_lea.vmem %s329_s15, 6144 }
  0x16   : > { %p1917_p13 = pnand %p1909_p11, %p1575_p12  ;;  %s341_s26 = sshll.u32 %s1784_s24, 4  ;;  %s342_s26 = int_to_ptr.vmem [resolvable:$true] %s341_s26 }
  0x17   : > { %p1657_p1 = scmp.ne.s32.totalorder %s329_s15, %s1656_s23  ;;  %p1664_p5 = scmp.lt.s32.totalorder %s329_s15, %s329_s15 }
  0x18   : > { %p1647_p0 = pneg %p1917_p13  ;;  %p1665_p6 = scmp.lt.s32.totalorder %s1656_s23, %s1656_s23 }
  0x1a   : > { %p1659_p2 = pnand %p1657_p1, %p1647_p0  ;;  %p1666_p7 = por %p1665_p6, %p1664_p5 }
  0x1c   : > { %p1660_p3 = pneg %p1659_p2 }
  0x1e   : > { %p1667_p9 = pnand %p1666_p7, %p1660_p3 }
  0x20   : > { %1670 = shalt.err (!%p1667_p9)
}
  0x21   : > { %s1785_s28 = smov 128   ;;  %s1786_s14 = smov 8  }
  0x22   : > { %1578 = dma.hbm_to_vmem [thread:$0]  (!%p1917_p13), %s2150_s2, 6144, %s329_s15, [#allocation3], %s1785_s28, %s1785_s28, %s1786_s14  }
  0x23   : > { %s1682_s21 = scalar_lea.vmem %s342_s26, 6144  ;;  %p1690_p8 = scmp.lt.s32.totalorder %s342_s26, %s342_s26 }
  0x24   : > { %p1683_p12 = scmp.ne.s32.totalorder %s342_s26, %s1682_s21  ;;  %p1691_p4 = scmp.lt.s32.totalorder %s1682_s21, %s1682_s21 }
  0x26   : > { %p1685_p1 = pnand %p1683_p12, %p1647_p0  ;;  %p1692_p5 = por %p1691_p4, %p1690_p8 }
  0x28   : > { %p1686_p2 = pneg %p1685_p1 }
  0x2a   : > { %p1693_p3 = pnand %p1692_p5, %p1686_p2 }
  0x2c   : > { %1696 = shalt.err (!%p1693_p3)
}
  0x2d   : > { %1581 = dma.hbm_to_vmem [thread:$0]  (!%p1917_p13), %s2151_s3, 6144, %s342_s26, [#allocation6], %s1785_s28, %s1785_s28, %s1786_s14  }
  0x2e   : > { %400 = sbr.rel (%p1905_p10) target bundleno = 548 (0x224), region = 64 }
  0x33   : > { %1748 = dma.done.wait (%p1909_p11), [#allocation3], 6144  }
  0x34   : > { %1750 = vsyncadd (%p1909_p11), [#allocation3], 4294961152 }
  0x35   : > { %1752 = dma.done.wait (%p1909_p11), [#allocation6], 6144  }
  0x36   : > { %1754 = vsyncadd (%p1909_p11), [#allocation6], 4294961152  ;;  %v508_v0 = vld [vmem:[#allocation2 + $0xf8] sm:$0xff]  ;;  %v507_v2 = vld [vmem:[#allocation2 + $0xf0] sm:$0xff]  ;;  %p455_p4 = scmp.lt.s32.totalorder %s1773_s20, 1  ;;  %v1787_v56 = vmov 0.0  }
  0x37   : > { %v492_v1 = vld [vmem:[#allocation2 + $0x78] sm:$0xff]  ;;  %1265 = vmatprep.subr.mxu0 %v508_v0  ;;  %v491_v4 = vld [vmem:[#allocation2 + $0x70] sm:$0xff]  ;;  %v506_v5 = vld [vmem:[#allocation2 + $0xe8] sm:$0xff]  ;;  %vm1788_vm0 = vmmov 0   ;;  %vm751_vm3 = vcmask 1046528   ;;  %vm913_vm4 = vcmask 1045504  }
  0x38   : > { %v524_v3 = vld [vmem:[#allocation2 + $0x178] sm:$0xff]  ;;  %1266 = vmatpush3.msra.mxu0 %v492_v1  ;;  %v523_v6 = vld [vmem:[#allocation2 + $0x170] sm:$0xff]  ;;  %v490_v7 = vld [vmem:[#allocation2 + $0x68] sm:$0xff]  ;;  %s1953_s21 = scalar_select %p455_p4, %s1773_s20, 1 }
  0x39   : > { %1389 = vmatprep.subr.mxu1 %v524_v3  ;;  %1267 = vmatprep.subr.mxu0 %v507_v2  ;;  %v522_v8 = vld [vmem:[#allocation2 + $0x168] sm:$0xff]  ;;  %v505_v9 = vld [vmem:[#allocation2 + $0xe0] sm:$0xff]  ;;  %v504_v12 = vld [vmem:[#allocation2 + $0xd8] sm:$0xff]  ;;  %s452_s30 = sand.u32 1, %s1765_s18   ;;  %p2171_p10 = scmp.ne.s32.totalorder %s2165_s27, 0 }
  0x3a   : > { %1390 = vmatpush3.msra.mxu1 %v524_v3  ;;  %1268 = vmatpush3.msra.mxu0 %v491_v4  ;;  %v489_v10 = vld [vmem:[#allocation2 + $0x60] sm:$0xff]  ;;  %v488_v13 = vld [vmem:[#allocation2 + $0x58] sm:$0xff]  ;;  %v503_v15 = vld [vmem:[#allocation2 + $0xd0] sm:$0xff]  ;;  %s1564_s25 = smul.u32 48, %s1953_s21  ;;  %s1249_s26 = sshll.u32 %s452_s30, 3 }
  0x3b   : > { %1391 = vmatprep.subr.mxu1 %v523_v6  ;;  %1269 = vmatprep.subr.mxu0 %v506_v5  ;;  %v521_v11 = vld [vmem:[#allocation2 + $0x160] sm:$0xff]  ;;  %v520_v14 = vld [vmem:[#allocation2 + $0x158] sm:$0xff]  ;;  %v487_v16 = vld [vmem:[#allocation2 + $0x50] sm:$0xff]  ;;  %s454_s24 = scalar_lea.vmem [#allocation7], %s1249_s26  ;;  %s1112_s15 = scalar_lea.sflag [#allocation4], %s452_s30 }
  0x3c   : > { %1392 = vmatpush3.msra.mxu1 %v523_v6  ;;  %1270 = vmatpush3.msra.mxu0 %v490_v7  ;;  %v519_v17 = vld [vmem:[#allocation2 + $0x150] sm:$0xff]  ;;  %v502_v18 = vld [vmem:[#allocation2 + $0xc8] sm:$0xff]  ;;  %v501_v21 = vld [vmem:[#allocation2 + $0xc0] sm:$0xff]  ;;  %s463_s13 = scalar_lea.vmem %s2148_s0, %s1564_s25  ;;  %s1126_s23 = sshll.u32 %s454_s24, 4  ;;  %s1127_s23 = int_to_ptr.vmem [resolvable:$true] %s1126_s23 }
  0x3d   : > { %1393 = vmatprep.subr.mxu1 %v522_v8  ;;  %1271 = vmatprep.subr.mxu0 %v505_v9  ;;  %v486_v19 = vld [vmem:[#allocation2 + $0x48] sm:$0xff]  ;;  %v485_v22 = vld [vmem:[#allocation2 + $0x40] sm:$0xff]  ;;  %v500_v24 = vld [vmem:[#allocation2 + $0xb8] sm:$0xff]  ;;  %s1697_s16 = scalar_lea.vmem %s1127_s23, 128  ;;  %s1789_s28 = smov [#allocation7]  }
  0x3e   : > { %1394 = vmatpush3.msra.mxu1 %v522_v8  ;;  %1272 = vmatpush3.msra.mxu0 %v489_v10  ;;  %v518_v20 = vld [vmem:[#allocation2 + $0x148] sm:$0xff]  ;;  %v517_v23 = vld [vmem:[#allocation2 + $0x140] sm:$0xff]  ;;  %v484_v25 = vld [vmem:[#allocation2 + $0x38] sm:$0xff]  ;;  %p1698_p8 = scmp.ne.s32.totalorder %s1127_s23, %s1697_s16 }
  0x3f   : > { %1395 = vmatprep.subr.mxu1 %v521_v11  ;;  %1273 = vmatprep.subr.mxu0 %v504_v12  ;;  %v516_v26 = vld [vmem:[#allocation2 + $0x138] sm:$0xff]  ;;  %v499_v27 = vld [vmem:[#allocation2 + $0xb0] sm:$0xff]  ;;  %v498_v30 = vld [vmem:[#allocation2 + $0xa8] sm:$0xff] }
  0x40   : > { %1396 = vmatpush3.msra.mxu1 %v521_v11  ;;  %1274 = vmatpush3.msra.mxu0 %v488_v13  ;;  %v483_v28 = vld [vmem:[#allocation2 + $0x30] sm:$0xff]  ;;  %v482_v31 = vld [vmem:[#allocation2 + $0x28] sm:$0xff]  ;;  %v497_v33 = vld [vmem:[#allocation2 + $0xa0] sm:$0xff]  ;;  %p1699_p11 = pnand %p1698_p8, %p2171_p10 }
  0x41   : > { %1397 = vmatprep.subr.mxu1 %v520_v14  ;;  %1275 = vmatprep.subr.mxu0 %v503_v15  ;;  %v515_v29 = vld [vmem:[#allocation2 + $0x130] sm:$0xff]  ;;  %v514_v32 = vld [vmem:[#allocation2 + $0x128] sm:$0xff]  ;;  %v481_v34 = vld [vmem:[#allocation2 + $0x20] sm:$0xff] }
  0x42   : > { %1398 = vmatpush3.msra.mxu1 %v520_v14  ;;  %1276 = vmatpush3.msra.mxu0 %v487_v16  ;;  %v513_v35 = vld [vmem:[#allocation2 + $0x120] sm:$0xff]  ;;  %v496_v36 = vld [vmem:[#allocation2 + $0x98] sm:$0xff]  ;;  %v495_v39 = vld [vmem:[#allocation2 + $0x90] sm:$0xff]  ;;  %p1700_p13 = pneg %p1699_p11 }
  0x43   : > { %1399 = vmatprep.subr.mxu1 %v519_v17  ;;  %1277 = vmatprep.subr.mxu0 %v502_v18  ;;  %v480_v37 = vld [vmem:[#allocation2 + $0x18] sm:$0xff]  ;;  %v479_v40 = vld [vmem:[#allocation2 + $0x10] sm:$0xff]  ;;  %v494_v42 = vld [vmem:[#allocation2 + $0x88] sm:$0xff] }
  0x44   : > { %1400 = vmatpush3.msra.mxu1 %v519_v17  ;;  %1278 = vmatpush3.msra.mxu0 %v486_v19  ;;  %v512_v38 = vld [vmem:[#allocation2 + $0x118] sm:$0xff]  ;;  %v511_v41 = vld [vmem:[#allocation2 + $0x110] sm:$0xff]  ;;  %v478_v43 = vld [vmem:[#allocation2 + $0x8] sm:$0xff] }
  0x45   : > { %1401 = vmatprep.subr.mxu1 %v518_v20  ;;  %1279 = vmatprep.subr.mxu0 %v501_v21  ;;  %v510_v44 = vld [vmem:[#allocation2 + $0x108] sm:$0xff]  ;;  %v493_v45 = vld [vmem:[#allocation2 + $0x80] sm:$0xff]  ;;  %v473_v50 = vld [vmem:[%s463_s13 + $0x10] sm:$0xff] }
  0x46   : > { %1402 = vmatpush3.msra.mxu1 %v518_v20  ;;  %1280 = vmatpush3.msra.mxu0 %v485_v22  ;;  %v472_v46 = vld [vmem:[%s463_s13 + $0x8] sm:$0xff]  ;;  %v477_v47 = vld [vmem:[#allocation2] sm:$0xff]  ;;  %v474_v53 = vld [vmem:[%s463_s13 + $0x18] sm:$0x3] }
  0x47   : > { %1403 = vmatprep.subr.mxu1 %v517_v23  ;;  %1281 = vmatprep.subr.mxu0 %v500_v24  ;;  %v471_v48 = vld [vmem:[%s463_s13] sm:$0xff]  ;;  %v476_v51 = vld [vmem:[%s463_s13 + $0x28] sm:$0x3]  ;;  %v731_v54 = vld [vmem:[#allocation5 + $0x78] sm:$0xff] }
  0x48   : > { %1404 = vmatpush3.msra.mxu1 %v517_v23  ;;  %1282 = vmatpush3.msra.mxu0 %v484_v25  ;;  %v509_v49 = vld [vmem:[#allocation2 + $0x100] sm:$0xff]  ;;  %v748_v55 = vld [vmem:[#allocation5 + $0xf8] sm:$0xff]  ;;  %v730_v57 = vld [vmem:[#allocation5 + $0x70] sm:$0xff]  ;;  %v696_v23 = vlaneseq }
  0x49   : > { %1405 = vmatprep.subr.mxu1 %v516_v26  ;;  %1283 = vmatprep.subr.mxu0 %v499_v27  ;;  %v475_v52 = vld [vmem:[%s463_s13 + $0x20] sm:$0x3]  ;;  %v747_v58 = vld [vmem:[#allocation5 + $0xf0] sm:$0xff]  ;;  %v729_v59 = vld [vmem:[#allocation5 + $0x68] sm:$0xff]  ;;  %s1251_s13 = sshll.u32 %s1953_s21, 3  ;;  %s1262_s21 = sshll.u32 %s1773_s20, 7 }
  0x4a   : > { %1406 = vmatpush3.msra.mxu1 %v516_v26  ;;  %1284 = vmatpush3.msra.mxu0 %v483_v28  ;;  %v746_v60 = vld [vmem:[#allocation5 + $0xe8] sm:$0xff]  ;;  %v728_v61 = vld [vmem:[#allocation5 + $0x60] sm:$0xff]  ;;  %v727_v63 = vld [vmem:[#allocation5 + $0x58] sm:$0xff]  ;;  %v697_v27 = vshrl.u32 %v696_v23, 7  ;;  %s470_s14 = scalar_lea.vmem %s2149_s1, %s1251_s13  ;;  %s1124_s13 = scalar_lea.hbm %s2159_s11, %s1262_s21 }
  0x4b   : > { %1407 = vmatprep.subr.mxu1 %v515_v29  ;;  %1285 = vmatprep.subr.mxu0 %v498_v30  ;;  %v745_v62 = vld [vmem:[#allocation5 + $0xe0] sm:$0xff]  ;;  %v744_v0 = vld [vmem:[#allocation5 + $0xd8] sm:$0xff]  ;;  %v726_v1 = vld [vmem:[#allocation5 + $0x50] sm:$0xff] }
  0x4c   : > { %1408 = vmatpush3.msra.mxu1 %v515_v29  ;;  %1286 = vmatpush3.msra.mxu0 %v482_v31  ;;  %v743_v2 = vld [vmem:[#allocation5 + $0xd0] sm:$0xff]  ;;  %v725_v3 = vld [vmem:[#allocation5 + $0x48] sm:$0xff]  ;;  %v724_v4 = vld [vmem:[#allocation5 + $0x40] sm:$0xff] }
  0x4d   : > { %1409 = vmatprep.subr.mxu1 %v514_v32  ;;  %1287 = vmatprep.subr.mxu0 %v497_v33  ;;  %v723_v5 = vld [vmem:[#allocation5 + $0x38] sm:$0xff]  ;;  %v722_v6 = vld [vmem:[#allocation5 + $0x30] sm:$0xff]  ;;  %v742_v7 = vld [vmem:[#allocation5 + $0xc8] sm:$0xff] }
  0x4e   : > { %1410 = vmatpush3.msra.mxu1 %v514_v32  ;;  %1288 = vmatpush3.msra.mxu0 %v481_v34  ;;  %v721_v8 = vld [vmem:[#allocation5 + $0x28] sm:$0xff]  ;;  %v741_v9 = vld [vmem:[#allocation5 + $0xc0] sm:$0xff]  ;;  %v740_v11 = vld [vmem:[#allocation5 + $0xb8] sm:$0xff] }
  0x4f   : > { %1411 = vmatprep.subr.mxu1 %v513_v35  ;;  %1289 = vmatprep.subr.mxu0 %v496_v36  ;;  %v720_v10 = vld [vmem:[#allocation5 + $0x20] sm:$0xff]  ;;  %v719_v12 = vld [vmem:[#allocation5 + $0x18] sm:$0xff]  ;;  %v739_v13 = vld [vmem:[#allocation5 + $0xb0] sm:$0xff]  ;;  %v1254_v36 = vadd.s32 4294967295, %v697_v27 }
  0x50   : > { %1412 = vmatpush3.msra.mxu1 %v513_v35  ;;  %1290 = vmatpush3.msra.mxu0 %v480_v37  ;;  %v718_v14 = vld [vmem:[#allocation5 + $0x10] sm:$0xff]  ;;  %v738_v15 = vld [vmem:[#allocation5 + $0xa8] sm:$0xff]  ;;  %v737_v17 = vld [vmem:[#allocation5 + $0xa0] sm:$0xff]  ;;  %v698_v35 = vadd.s32 8, %v697_v27 }
  0x51   : > { %1413 = vmatprep.subr.mxu1 %v512_v38  ;;  %1291 = vmatprep.subr.mxu0 %v495_v39  ;;  %v717_v16 = vld [vmem:[#allocation5 + $0x8] sm:$0xff]  ;;  %v716_v18 = vld [vmem:[#allocation5] sm:$0xff]  ;;  %v736_v19 = vld [vmem:[#allocation5 + $0x98] sm:$0xff]  ;;  %vm704_vm1 = vcmp.ge.s32.totalorder %v1254_v36, 0 }
  0x52   : > { %1414 = vmatpush3.msra.mxu1 %v512_v38  ;;  %1292 = vmatpush3.msra.mxu0 %v479_v40  ;;  %v735_v20 = vld [vmem:[#allocation5 + $0x90] sm:$0xff]  ;;  %v734_v21 = vld [vmem:[#allocation5 + $0x88] sm:$0xff]  ;;  %v733_v22 = vld [vmem:[#allocation5 + $0x80] sm:$0xff] }
  0x53   : > { %1415 = vmatprep.subr.mxu1 %v511_v41  ;;  %1293 = vmatprep.subr.mxu0 %v494_v42  ;;  %v1252_v31 = vld [vmem:[%s2153_s5] ss:$0 sm:$0xff] }
  0x54   : > { %1416 = vmatpush3.msra.mxu1 %v511_v41  ;;  %1294 = vmatpush3.msra.mxu0 %v478_v43  ;;  %v1253_v33 = vld [vmem:[%s2154_s6] ss:$0 sm:$0xff]  ;;  %v1255_v41 = vadd.s32 4294967295, %v698_v35 }
  0x55   : > { %1417 = vmatprep.subr.mxu1 %v510_v44  ;;  %1295 = vmatprep.subr.mxu0 %v493_v45  ;;  %v1258_v36 = vld [vmem:[%s2156_s8] ss:$0 sm:$0xff] }
  0x56   : > { %589 = vmatprep.mubr.f32.mxu0 %v472_v46  ;;  %1296 = vmatpush3.msra.mxu0 %v477_v47  ;;  %v1020_v46 = vld [vmem:[%s2152_s4 + $0x70] sm:$0xff]  ;;  %vm707_vm2 = vcmp.lt.s32.totalorder %v1255_v41, 8 }
  0x57   : > { %1418 = vmatpush3.msra.mxu1 %v510_v44  ;;  %590 = vmatmul.mubr.f32.vlgmr.msra.gmra.mxu0 %v471_v48  ;;  %v1021_v44 = vld [vmem:[%s2152_s4 + $0x78] sm:$0xff] }
  0x58   : > { %1419 = vmatprep.subr.mxu1 %v509_v49  ;;  %1421 = vmatprep.mubr.f32.mxu1 %v473_v50 }
  0x59   : > { %1420 = vmatpush3.msra.mxu1 %v509_v49  ;;  %594 = vmatprep.mubr.f32.mxu0 %v475_v52  ;;  %v1019_v49 = vld [vmem:[%s2152_s4 + $0x68] sm:$0xff] }
  0x5a   : > { %1422 = vmatmul.mubr.f32.vlgmr.msra.gmra.mxu1 %v476_v51  ;;  %1459 = vmatprep.subr.mxu1 %v1787_v56  ;;  %v1018_v51 = vld [vmem:[%s2152_s4 + $0x60] sm:$0xff] }
  0x5b   : > { %1424 = vmatprep.subr.mxu0 %v1787_v56  ;;  %595 = vmatmul.mubr.f32.gmra.mxu0 %v474_v53 }
  0x5c   : > { %1460 = vmatpush3.msra.mxu1 %v731_v54  ;;  %1425 = vmatpush3.msra.mxu0 %v748_v55  ;;  %v912_v54 = vld [vmem:[#allocation5 + $0x178] sm:$0xff] }
  0x5d   : > { %1461 = vmatprep.subr.mxu1 %v1787_v56  ;;  %1426 = vmatprep.subr.mxu0 %v1787_v56  ;;  %v1017_v55 = vld [vmem:[%s2152_s4 + $0x58] sm:$0xff] }
  0x5e   : > { %1462 = vmatpush3.msra.mxu1 %v730_v57  ;;  %1427 = vmatpush3.msra.mxu0 %v747_v58  ;;  %v911_v58 = vld [vmem:[#allocation5 + $0x170] sm:$0xff] }
  0x5f   : > { %1463 = vmatprep.subr.mxu1 %v1787_v56  ;;  %1428 = vmatprep.subr.mxu0 %v1787_v56 }
  0x60   : > { %1464 = vmatpush3.msra.mxu1 %v729_v59  ;;  %1429 = vmatpush3.msra.mxu0 %v746_v60  ;;  %v1016_v59 = vld [vmem:[%s2152_s4 + $0x50] sm:$0xff]  ;;  %v910_v60 = vld [vmem:[#allocation5 + $0x168] sm:$0xff] }
  0x61   : > { %1465 = vmatprep.subr.mxu1 %v1787_v56  ;;  %1430 = vmatprep.subr.mxu0 %v1787_v56 }
  0x62   : > { %1466 = vmatpush3.msra.mxu1 %v728_v61  ;;  %1431 = vmatpush3.msra.mxu0 %v745_v62  ;;  %v1015_v61 = vld [vmem:[%s2152_s4 + $0x48] sm:$0xff]  ;;  %v909_v62 = vld [vmem:[#allocation5 + $0x160] sm:$0xff] }
  0x63   : > { %1467 = vmatprep.subr.mxu1 %v1787_v56  ;;  %1432 = vmatprep.subr.mxu0 %v1787_v56 }
  0x64   : > { %1468 = vmatpush3.msra.mxu1 %v727_v63  ;;  %1433 = vmatpush3.msra.mxu0 %v744_v0  ;;  %v1014_v63 = vld [vmem:[%s2152_s4 + $0x40] sm:$0xff]  ;;  %v908_v0 = vld [vmem:[#allocation5 + $0x158] sm:$0xff] }
  0x65   : > { %1469 = vmatprep.subr.mxu1 %v1787_v56  ;;  %1434 = vmatprep.subr.mxu0 %v1787_v56 }
  0x66   : > { %1470 = vmatpush3.msra.mxu1 %v726_v1  ;;  %1435 = vmatpush3.msra.mxu0 %v743_v2  ;;  %v1013_v1 = vld [vmem:[%s2152_s4 + $0x38] sm:$0xff]  ;;  %v907_v2 = vld [vmem:[#allocation5 + $0x150] sm:$0xff] }
  0x67   : > { %1471 = vmatprep.subr.mxu1 %v1787_v56  ;;  %1436 = vmatprep.subr.mxu0 %v1787_v56 }
  0x68   : > { %1472 = vmatpush3.msra.mxu1 %v725_v3  ;;  %1437 = vmatpush3.msra.mxu0 %v742_v7  ;;  %v1012_v3 = vld [vmem:[%s2152_s4 + $0x30] sm:$0xff]  ;;  %v1010_v7 = vld [vmem:[%s2152_s4 + $0x20] sm:$0xff] }
  0x69   : > { %1473 = vmatprep.subr.mxu1 %v1787_v56  ;;  %1438 = vmatprep.subr.mxu0 %v1787_v56 }
  0x6a   : > { %1474 = vmatpush3.msra.mxu1 %v724_v4  ;;  %1439 = vmatpush3.msra.mxu0 %v741_v9  ;;  %v906_v4 = vld [vmem:[#allocation5 + $0x148] sm:$0xff]  ;;  %v1009_v9 = vld [vmem:[%s2152_s4 + $0x18] sm:$0xff] }
  0x6b   : > { %1475 = vmatprep.subr.mxu1 %v1787_v56  ;;  %1440 = vmatprep.subr.mxu0 %v1787_v56 }
  0x6c   : > { %1476 = vmatpush3.msra.mxu1 %v723_v5  ;;  %1441 = vmatpush3.msra.mxu0 %v740_v11  ;;  %v1011_v5 = vld [vmem:[%s2152_s4 + $0x28] sm:$0xff]  ;;  %v1008_v11 = vld [vmem:[%s2152_s4 + $0x10] sm:$0xff] }
  0x6d   : > { %1477 = vmatprep.subr.mxu1 %v1787_v56  ;;  %1442 = vmatprep.subr.mxu0 %v1787_v56 }
  0x6e   : > { %1478 = vmatpush3.msra.mxu1 %v722_v6  ;;  %1443 = vmatpush3.msra.mxu0 %v739_v13  ;;  %v905_v6 = vld [vmem:[#allocation5 + $0x140] sm:$0xff]  ;;  %v1007_v13 = vld [vmem:[%s2152_s4 + $0x8] sm:$0xff] }
  0x6f   : > { %1479 = vmatprep.subr.mxu1 %v1787_v56  ;;  %1444 = vmatprep.subr.mxu0 %v1787_v56 }
  0x70   : > { %1480 = vmatpush3.msra.mxu1 %v721_v8  ;;  %1445 = vmatpush3.msra.mxu0 %v738_v15  ;;  %v904_v8 = vld [vmem:[#allocation5 + $0x138] sm:$0xff]  ;;  %v1006_v15 = vld [vmem:[%s2152_s4] sm:$0xff] }
  0x71   : > { %1481 = vmatprep.subr.mxu1 %v1787_v56  ;;  %1446 = vmatprep.subr.mxu0 %v1787_v56 }
  0x72   : > { %1482 = vmatpush3.msra.mxu1 %v720_v10  ;;  %1447 = vmatpush3.msra.mxu0 %v737_v17  ;;  %v903_v10 = vld [vmem:[#allocation5 + $0x130] sm:$0xff]  ;;  %v1005_v17 = vld [vmem:[%s470_s14] sm:$0xff]  ;;  %s1701_s14 = sshll.u32 %s1789_s28, 4  ;;  %s1702_s14 = int_to_ptr.vmem [resolvable:$false] %s1701_s14 }
  0x73   : > { %1483 = vmatprep.subr.mxu1 %v1787_v56  ;;  %1448 = vmatprep.subr.mxu0 %v1787_v56  ;;  %s1703_s20 = scalar_lea.vmem %s1702_s14, 256  ;;  %p1704_p0 = scmp.lt.s32.totalorder %s1127_s23, %s1702_s14 }
  0x74   : > { %1484 = vmatpush3.msra.mxu1 %v719_v12  ;;  %1491 = vmatprep.mubr.msk.f32.mxu1 %vm1788_vm0, %v1787_v56  ;;  %v902_v12 = vld [vmem:[#allocation5 + $0x128] sm:$0xff]  ;;  %p1705_p6 = scmp.lt.s32.totalorder %s1703_s20, %s1697_s16 }
  0x75   : > { %1485 = vmatprep.subr.mxu1 %v1787_v56  ;;  %1449 = vmatpush3.msra.mxu0 %v736_v19  ;;  %v898_v19 = vld [vmem:[#allocation5 + $0x108] sm:$0xff] }
  0x76   : > { %1486 = vmatpush3.msra.mxu1 %v718_v14  ;;  %1450 = vmatprep.subr.mxu0 %v1787_v56  ;;  %v901_v14 = vld [vmem:[#allocation5 + $0x120] sm:$0xff]  ;;  %p1706_p7 = por %p1705_p6, %p1704_p0 }
  0x77   : > { %1487 = vmatprep.subr.mxu1 %v1787_v56  ;;  %1456 = vmatprep.mubr.msk.f32.mxu0 %vm1788_vm0, %v1787_v56 }
  0x78   : > { %1488 = vmatpush3.msra.mxu1 %v717_v16  ;;  %1451 = vmatpush3.msra.mxu0 %v735_v20  ;;  %v900_v16 = vld [vmem:[#allocation5 + $0x118] sm:$0xff]  ;;  %p1707_p9 = pnand %p1706_p7, %p1700_p13 }
  0x79   : > { %1489 = vmatprep.subr.mxu1 %v1787_v56  ;;  %1452 = vmatprep.subr.mxu0 %v1787_v56 }
  0x7a   : > { %1490 = vmatpush3.msra.mxu1 %v716_v18  ;;  %1453 = vmatpush3.msra.mxu0 %v734_v21  ;;  %v899_v18 = vld [vmem:[#allocation5 + $0x110] sm:$0xff]  ;;  %v897_v21 = vld [vmem:[#allocation5 + $0x100] sm:$0xff] }
  0x7b   : > { %1529 = vmatprep.subr.mxu1 %v1787_v56  ;;  %1454 = vmatprep.subr.mxu0 %v1787_v56 }
  0x7c   : > { %1455 = vmatpush3.msra.mxu0 %v733_v22 }
  0x7d   : > { %1494 = vmatprep.subr.mxu0 %v1787_v56 }
 0x117   : > { %v1297_v24 = vpop.f32.mrf.mxu0 }
 0x119   : > { %v1298_v25 = vpop.f32.mrf.mxu0 }
 0x11a   : > { %v1423_v26 = vpop.f32.mrf.mxu1  ;;  %v1299_v28 = vadd.f32 %v1298_v25, %v1297_v24 }
 0x11b   : > { %v1300_v29 = vpop.f32.mrf.mxu0 }
 0x11c   : > { %v666_v30 = vpop.f32.mrf.mxu1 }
 0x11d   : > { %v667_v32 = vadd.f32 %v1299_v28, %v666_v30  ;;  %v1301_v34 = vpop.f32.mrf.mxu0  ;;  %v1259_v30 = vld [vmem:[%s2157_s9] ss:$0 sm:$0xff] }
 0x11e   : > { %v1302_v38 = vadd.f32 %v1301_v34, %v1300_v29  ;;  %v1260_v34 = vld [vmem:[%s2158_s10] ss:$0 sm:$0xff] }
 0x11f   : > { %v682_v37 = vmul.f32 %v1252_v31, %v667_v32 }
 0x120   : > { %v672_v40 = vadd.f32 %v1423_v26, %v1302_v38 }
 0x121   : > { %v691_v39 = vadd.f32 %v1253_v33, %v682_v37 }
 0x122   : > { %v683_v43 = vmul.f32 %v1252_v31, %v672_v40 }
 0x123   : > { %v693_v42 = vmax.f32 %v691_v39, 0.0 }
 0x124   : > { %v692_v45 = vadd.f32 %v1253_v33, %v683_v43 }
 0x125   : > { %1492 = vmatmul.mubr.msk.f32.vlgmr.msra.gmra.mxu1 %vm704_vm1, %v693_v42  ;;  %v2011_v48 = vsel %vm704_vm1, %v693_v42, 0.0 }
 0x126   : > { %1530 = vmatpush3.msra.mxu1 %v1021_v44  ;;  %1561 = vmatprep.mubr.msk.f32.mxu1 %vm1788_vm0, %v1787_v56  ;;  %v694_v47 = vmax.f32 %v692_v45, 0.0  ;;  %v752_v52 = vrot.slane %v2011_v48, 1  ;;  %v914_v22 = vrot.slane %v2011_v48, 2 }
 0x127   : > { %1531 = vmatprep.subr.mxu1 %v1787_v56 }
 0x128   : > { %1532 = vmatpush3.msra.mxu1 %v1020_v46  ;;  %v2017_v50 = vsel %vm707_vm2, %v694_v47, 0.0 }
 0x129   : > { %1533 = vmatprep.subr.mxu1 %v1787_v56  ;;  %v753_v53 = vrot.slane %v2017_v50, 1  ;;  %v915_v20 = vrot.slane %v2017_v50, 2 }
 0x12a   : > { %1534 = vmatpush3.msra.mxu1 %v1019_v49 }
 0x12b   : > { %1535 = vmatprep.subr.mxu1 %v1787_v56  ;;  %v754_v57 = vsel %vm751_vm3, %v752_v52, %v753_v53  ;;  %v916_v23 = vsel %vm913_vm4, %v914_v22, %v915_v20 }
 0x12c   : > { %1536 = vmatpush3.msra.mxu1 %v1018_v51  ;;  %1457 = vmatmul.mubr.f32.vlgmr.msra.gmra.mxu0 %v754_v57 }
 0x12d   : > { %1537 = vmatprep.subr.mxu1 %v1787_v56  ;;  %1495 = vmatpush3.msra.mxu0 %v912_v54 }
 0x12e   : > { %1538 = vmatpush3.msra.mxu1 %v1017_v55  ;;  %1496 = vmatprep.subr.mxu0 %v1787_v56 }
 0x12f   : > { %1539 = vmatprep.subr.mxu1 %v1787_v56  ;;  %1497 = vmatpush3.msra.mxu0 %v911_v58 }
 0x130   : > { %1540 = vmatpush3.msra.mxu1 %v1016_v59  ;;  %1498 = vmatprep.subr.mxu0 %v1787_v56 }
 0x131   : > { %1541 = vmatprep.subr.mxu1 %v1787_v56  ;;  %1499 = vmatpush3.msra.mxu0 %v910_v60 }
 0x132   : > { %1542 = vmatpush3.msra.mxu1 %v1015_v61  ;;  %1500 = vmatprep.subr.mxu0 %v1787_v56 }
 0x133   : > { %1543 = vmatprep.subr.mxu1 %v1787_v56  ;;  %1501 = vmatpush3.msra.mxu0 %v909_v62 }
 0x134   : > { %1544 = vmatpush3.msra.mxu1 %v1014_v63  ;;  %1502 = vmatprep.subr.mxu0 %v1787_v56 }
 0x135   : > { %1545 = vmatprep.subr.mxu1 %v1787_v56  ;;  %1503 = vmatpush3.msra.mxu0 %v908_v0 }
 0x136   : > { %1546 = vmatpush3.msra.mxu1 %v1013_v1  ;;  %1504 = vmatprep.subr.mxu0 %v1787_v56 }
 0x137   : > { %1547 = vmatprep.subr.mxu1 %v1787_v56  ;;  %1505 = vmatpush3.msra.mxu0 %v907_v2 }
 0x138   : > { %1548 = vmatpush3.msra.mxu1 %v1012_v3  ;;  %1506 = vmatprep.subr.mxu0 %v1787_v56 }
 0x139   : > { %1549 = vmatprep.subr.mxu1 %v1787_v56  ;;  %1507 = vmatpush3.msra.mxu0 %v906_v4 }
 0x13a   : > { %1550 = vmatpush3.msra.mxu1 %v1011_v5  ;;  %1508 = vmatprep.subr.mxu0 %v1787_v56 }
 0x13b   : > { %1551 = vmatprep.subr.mxu1 %v1787_v56  ;;  %1509 = vmatpush3.msra.mxu0 %v905_v6 }
 0x13c   : > { %1552 = vmatpush3.msra.mxu1 %v1010_v7  ;;  %1510 = vmatprep.subr.mxu0 %v1787_v56 }
 0x13d   : > { %1553 = vmatprep.subr.mxu1 %v1787_v56  ;;  %1511 = vmatpush3.msra.mxu0 %v904_v8 }
 0x13e   : > { %1554 = vmatpush3.msra.mxu1 %v1009_v9  ;;  %1512 = vmatprep.subr.mxu0 %v1787_v56 }
 0x13f   : > { %1555 = vmatprep.subr.mxu1 %v1787_v56  ;;  %1513 = vmatpush3.msra.mxu0 %v903_v10 }
 0x140   : > { %1556 = vmatpush3.msra.mxu1 %v1008_v11  ;;  %1514 = vmatprep.subr.mxu0 %v1787_v56 }
 0x141   : > { %1557 = vmatprep.subr.mxu1 %v1787_v56  ;;  %1515 = vmatpush3.msra.mxu0 %v902_v12 }
 0x142   : > { %1558 = vmatpush3.msra.mxu1 %v1007_v13  ;;  %1516 = vmatprep.subr.mxu0 %v1787_v56 }
 0x143   : > { %1559 = vmatprep.subr.mxu1 %v1787_v56  ;;  %1517 = vmatpush3.msra.mxu0 %v901_v14 }
 0x144   : > { %1526 = vmatprep.mubr.msk.f32.mxu0 %vm1788_vm0, %v1787_v56  ;;  %1518 = vmatprep.subr.mxu0 %v1787_v56 }
 0x145   : > { %1560 = vmatpush3.msra.mxu1 %v1006_v15  ;;  %1519 = vmatpush3.msra.mxu0 %v900_v16 }
 0x146   : > { %1562 = vmatmul.mubr.f32.vlgmr.msra.gmra.mxu1 %v1005_v17  ;;  %1520 = vmatprep.subr.mxu0 %v1787_v56 }
 0x147   : > { %1521 = vmatpush3.msra.mxu0 %v899_v18 }
 0x148   : > { %1522 = vmatprep.subr.mxu0 %v1787_v56 }
 0x149   : > { %1523 = vmatpush3.msra.mxu0 %v898_v19 }
 0x14a   : > { %1524 = vmatprep.subr.mxu0 %v1787_v56  ;;  %v1257_v56 = vld [vmem:[%s2155_s7] ss:$0 sm:$0xff] }
 0x14b   : > { %1525 = vmatpush3.msra.mxu0 %v897_v21 }
 0x14c   : > { %1527 = vmatmul.mubr.f32.vlgmr.msra.gmra.mxu0 %v916_v23 }
 0x1e5   : > { %v892_v24 = vpop.f32.mrf.mxu1 }
 0x1e7   : > { %v1493_v25 = vpop.f32.mrf.mxu1 }
 0x1ec   : > { %v822_v26 = vpop.f32.mrf.mxu0 }
 0x1ed   : > { %v893_v31 = vadd.f32 %v892_v24, %v822_v26 }
 0x1ee   : > { %v1458_v27 = vpop.f32.mrf.mxu0 }
 0x206   : > { %v1088_v28 = vpop.f32.mrf.mxu1 }
 0x207   : > { %v1099_v32 = vmul.f32 %v1259_v30, %v1088_v28 }
 0x208   : > { %v1563_v29 = vpop.f32.mrf.mxu1 }
 0x209   : > { %v1107_v39 = vadd.f32 %v1260_v34, %v1099_v32 }
 0x20c   : > { %v984_v33 = vpop.f32.mrf.mxu0 }
 0x20d   : > { %v988_v35 = vadd.f32 %v984_v33, %v893_v31 }
 0x20e   : > { %v1528_v37 = vpop.f32.mrf.mxu0 }
 0x20f   : > { %v996_v38 = vmul.f32 %v1257_v56, %v988_v35 }
 0x211   : > { %v1004_v40 = vadd.f32 %v1258_v36, %v996_v38 }
 0x213   : > { %v1108_v41 = vadd.f32 %v1107_v39, %v1004_v40 }
 0x215   : > { %v1109_v42 = vmax.f32 %v1108_v41, 0.0 }
 0x217   : > { %1110 = vst [vmem:[%s454_s24] sm:$0xff] %v1109_v42 }
 0x218   : > { %1710 = shalt.err (!%p1707_p9)
}
 0x219   : > { %s1711_s26 = scalar_lea.hbm %s1124_s13, 128  ;;  %s1715_s24 = scalar_lea.hbm %s2159_s11, 256 }
 0x21a   : > { %p1712_p12 = scmp.ne.s32.totalorder %s1124_s13, %s1711_s26  ;;  %p1716_p5 = scmp.lt.s32.totalorder %s1124_s13, %s2159_s11 }
 0x21b   : > { %p1717_p3 = scmp.lt.s32.totalorder %s1715_s24, %s1711_s26 }
 0x21c   : > { %p1713_p1 = pnand %p1712_p12, %p2171_p10 }
 0x21d   : > { %p1718_p4 = por %p1717_p3, %p1716_p5 }
 0x21e   : > { %p1714_p2 = pneg %p1713_p1 }
 0x220   : > { %p1719_p8 = pnand %p1718_p4, %p1714_p2 }
 0x222   : > { %1722 = shalt.err (!%p1719_p8)
}
 0x223   : > { %1573 = dma.vmem_to_hbm [thread:$0]  (%p2171_p10), %s1127_s23, 128, %s1124_s13, %s1112_s15  }
 0x224 PF: > { %p1590_p11 = scmp.ge.s32.totalorder %s1781_s22, 2  ;;  %s1138_s16 = sand.u32 1, %s1761_s17  }
 0x225   : > { %p2172_p13 = scmp.ne.s32.totalorder %s2166_s29, 0  ;;  %s1139_s28 = scalar_lea.sflag [#allocation4], %s1138_s16 }
 0x227   : > { %p1583_p0 = pnand %p1590_p11, %p2172_p13 }
 0x229   : > { %p1584_p6 = pneg %p1583_p0 }
 0x22b   : > { %1756 = dma.done.wait (%p1584_p6), %s1139_s28, 128  }
 0x22c   : > { %1758 = vsyncadd (%p1584_p6), %s1139_s28, 4294967168  ;;  %s26_s22 = sadd.s32 1, %s1781_s22   ;;  %s2173_s14 = sld [smem:[#allocation13_spill]] }
 0x22d   : > { %p23_p7 = scmp.ge.s32.totalorder %s26_s22, 4   ;;  %s2174_s20 = sld [smem:[#allocation11_spill]] }
 0x22e   : > { %s2175_s21 = sld [smem:[#allocation12_spill]]  ;;  %s2176_s17 = smov %s1765_s18 }
 0x22f   : > { %s2177_s18 = smov %s1769_s19  ;;  %25 = sbr.rel (!%p23_p7) target bundleno = 6 (0x6), region = 113 }
 0x232   : > { %s2178_s19 = smov %s2173_s14 }
 0x234   :  { %1144 = vsyncpa [#allocation3], 1 }
 0x235   :  { %1146 = vsyncpa [#allocation3 + $0x1], 1 }
 0x236   :  { %1147 = vsyncpa [#allocation6], 1 }
 0x237   :  { %1148 = vsyncpa [#allocation4], 1 }
 0x238   :  { %1150 = vsyncpa [#allocation4 + $0x1], 1 }

</bundles_post_ra>
